<compile_context>
chip_gen: v7x
topology: tpu7x:2x2x1
jax: 0.10.0
libtpu: 0.0.40
codegen_flags: <defaults>
</compile_context>

<pallas_src>
import functools

import jax
import jax.numpy as jnp
from jax.experimental import pallas as pl
from jax.experimental.pallas import tpu as pltpu


# ----------------------------------------------------------------------------- kernel

def _make_kernel(mxu_dtype):
    def kernel(x_ref, w1_ref, b1_ref, w2_ref, b2_ref, o_ref):
        if mxu_dtype is None:
            xv, w1v, w2v = x_ref[...], w1_ref[...], w2_ref[...]
        else:
            # In-register cast for the MXU only; inputs stay fp32 in HBM.
            xv = x_ref[...].astype(mxu_dtype)
            w1v = w1_ref[...].astype(mxu_dtype)
            w2v = w2_ref[...].astype(mxu_dtype)
        # hidden = relu(x @ W1 + b1) -- fp32 accumulation on the MXU.
        h = jnp.dot(xv, w1v, preferred_element_type=jnp.float32)
        h = jnp.maximum(h + b1_ref[...], 0.0)            # b1 is (1, hidden) fp32
        # logits = h @ W2 + b2 ; out = sigmoid(logits).  astype is identity in the
        # fp32 path; keeps the second matmul on the bf16 MXU path otherwise.
        logits = jnp.dot(h.astype(w2v.dtype), w2v,
                         preferred_element_type=jnp.float32)
        o_ref[...] = jax.nn.sigmoid(logits + b2_ref[...]).astype(o_ref.dtype)
    return kernel


# ----------------------------------------------------------------------------- helpers

def _round_up(a, m):
    return (a + m - 1) // m * m


def _lane_pad(n):
    return _round_up(max(int(n), 1), 128)


def _sub_pad(n):
    return _round_up(max(int(n), 1), 8)


def _vmem_bytes(tb, d, hidden, n_class, x_itemsize):
    """VMEM residency estimate, lane/sublane-padding aware."""
    def tile(rows, cols, itemsize):
        return _sub_pad(rows) * _lane_pad(cols) * itemsize
    x_b = 2 * tile(tb, d, x_itemsize)          # double-buffered streaming x tile
    o_b = 2 * tile(tb, n_class, 4)             # double-buffered fp32 output tile
    w_b = 2 * (tile(d, hidden, 4) + tile(1, hidden, 4)
               + tile(hidden, n_class, 4) + tile(1, n_class, 4))
    return x_b + o_b + w_b


def _vmem_budget_and_limit():
    """Per-generation VMEM tile budget and scoped-VMEM limit request."""
    try:
        cap = int(pltpu.get_tpu_info().vmem_capacity_bytes)
    except Exception:  # hardware query unavailable -> conservative (v7x-sized) cap
        cap = 64 << 20
    # v7x (64 MiB): ~45 MiB budget; v5e/v6e (128 MiB): ~100 MiB budget.
    budget = max(int(cap * 0.7), cap - (28 << 20))
    limit = min(budget + (8 << 20), cap - (8 << 20))
    return budget, int(limit)


# ----------------------------------------------------------------------------- wrapper

def ln_classifier_sigmoid(x, w1, b1, w2, b2, *, tb=None, tb_cap=4096,
                          mxu_dtype=None):
    """sigmoid(relu(x @ w1 + b1) @ w2 + b2).

    x:  [B, d_feature]        w1: [d_feature, hidden]   b1: [hidden]
    w2: [hidden, n_class]     b2: [n_class]
    mxu_dtype: optional dtype (e.g. jnp.bfloat16) for the matmul operands;
      cast happens inside the kernel (no extra HBM pass).  Output stays fp32.
    Returns [B, n_class] float32 in (0, 1).
    """
    B, d_feature = x.shape
    hidden = w1.shape[1]
    n_class = w2.shape[1]

    w1_f = w1.astype(jnp.float32)
    w2_f = w2.astype(jnp.float32)
    b1_2d = b1.reshape(1, hidden).astype(jnp.float32)
    b2_2d = b2.reshape(1, n_class).astype(jnp.float32)

    budget, vmem_limit = _vmem_budget_and_limit()
    x_itemsize = jnp.dtype(x.dtype).itemsize

    # --- batch tile selection (sublane-aligned, VMEM-budget constrained).
    if B <= 8:
        tb_eff = B                                     # full-extent block: always legal
    else:
        if tb is None:
            tb_eff = min(_round_up(B, 8), int(tb_cap))
        else:
            tb_eff = int(tb)
        tb_eff = max(8, _round_up(tb_eff, 8))
        while tb_eff > 8 and _vmem_bytes(tb_eff, d_feature, hidden, n_class,
                                         x_itemsize) > budget:
            tb_eff = max(8, _round_up(tb_eff // 2, 8))
        # Give both v7x TensorCores work if one tile would swallow the batch.
        if pl.cdiv(B, tb_eff) == 1 and B > 16:
            tb_eff = max(8, _round_up(pl.cdiv(B, 2), 8))

    grid = (pl.cdiv(B, tb_eff),)   # ragged last block handled by Pallas masking

    cost = pl.CostEstimate(
        flops=2 * B * (d_feature * hidden + hidden * n_class),
        transcendentals=B * n_class,
        bytes_accessed=(B * d_feature * x_itemsize + B * n_class * 4
                        + (d_feature * hidden + hidden * n_class
                           + hidden + n_class) * 4),
    )

    kernel = _make_kernel(mxu_dtype)

    out = pl.pallas_call(
        kernel,
        out_shape=jax.ShapeDtypeStruct((B, n_class), jnp.float32),
        grid_spec=pltpu.PrefetchScalarGridSpec(
            num_scalar_prefetch=0,
            grid=grid,
            in_specs=[
                pl.BlockSpec((tb_eff, d_feature), lambda i: (i, 0)),   # streaming x
                pl.BlockSpec((d_feature, hidden), lambda i: (0, 0)),   # W1 (whole)
                pl.BlockSpec((1, hidden), lambda i: (0, 0)),           # b1
                pl.BlockSpec((hidden, n_class), lambda i: (0, 0)),     # W2 (whole)
                pl.BlockSpec((1, n_class), lambda i: (0, 0)),          # b2
            ],
            out_specs=pl.BlockSpec((tb_eff, n_class), lambda i: (i, 0)),
        ),
        compiler_params=pltpu.CompilerParams(
            dimension_semantics=("parallel",),      # batch axis -> shard across TCs
            vmem_limit_bytes=vmem_limit,
        ),
        cost_estimate=cost,
    )(x, w1_f, b1_2d, w2_f, b2_2d)

    return out


def _reference(x, w1, b1, w2, b2):
    h = jnp.maximum(x @ w1 + b1, 0.0)
    return jax.nn.sigmoid(h @ w2 + b2)


# ----------------------------------------------------------------------------- demo

if __name__ == "__main__":
    # Small shapes consistent with the module: d_feature=32 -> hidden=16, n_class=4.
    # B=250 exercises the ragged last block (grid=2 with tb=128) and the
    # two-TensorCore split.
    B, d_feature, n_class = 250, 32, 4
    hidden = d_feature // 2

    key = jax.random.PRNGKey(0)
    kx, k1, kb1, k2, kb2 = jax.random.split(key, 5)

    x = jax.random.normal(kx, (B, d_feature), dtype=jnp.float32)

    # Deterministic synthetic params (uniform init, roughly torch Linear scale).
    lim1 = 1.0 / jnp.sqrt(d_feature)
    lim2 = 1.0 / jnp.sqrt(hidden)
    w1 = jax.random.uniform(k1, (d_feature, hidden), jnp.float32, -lim1, lim1)
    b1 = jax.random.uniform(kb1, (hidden,), jnp.float32, -lim1, lim1)
    w2 = jax.random.uniform(k2, (hidden, n_class), jnp.float32, -lim2, lim2)
    b2 = jax.random.uniform(kb2, (n_class,), jnp.float32, -lim2, lim2)

    ref = _reference(x, w1, b1, w2, b2)

    # fp32 path (faithful to the module).
    out = ln_classifier_sigmoid(x, w1, b1, w2, b2)
    out = jax.block_until_ready(out)
    assert out.shape == (B, n_class)
    assert jnp.allclose(out, ref, atol=1e-5, rtol=1e-5), "fp32 mismatch vs reference"

    # bf16-MXU path (in-kernel cast, no extra HBM pass), looser tolerance.
    out_bf16 = ln_classifier_sigmoid(x, w1, b1, w2, b2, mxu_dtype=jnp.bfloat16)
    out_bf16 = jax.block_until_ready(out_bf16)
    assert out_bf16.shape == (B, n_class)
    assert jnp.allclose(out_bf16, ref, atol=2e-2, rtol=2e-2), "bf16 mismatch vs reference"

    print("KERNEL_OK")
</pallas_src>

<mosaic_0001>
module attributes {stable_mosaic.version = 11 : i64} {
  func.func @kernel(%arg0: i32, %arg1: memref<128x32xf32, #tpu.memory_space<vmem>>, %arg2: memref<32x16xf32, #tpu.memory_space<vmem>>, %arg3: memref<1x16xf32, #tpu.memory_space<vmem>>, %arg4: memref<16x4xf32, #tpu.memory_space<vmem>>, %arg5: memref<1x4xf32, #tpu.memory_space<vmem>>, %arg6: memref<128x4xf32, #tpu.memory_space<vmem>>) attributes {dimension_semantics = [#tpu.dimension_semantics<parallel>], iteration_bounds = array<i64: 2>, scalar_prefetch = 0 : i64, scratch_operands = 0 : i64, tpu.core_type = #tpu.core_type<tc>, window_params = [{transform_indices = @transform_0, window_bounds = array<i64: 128, 32>}, {pipeline_mode = #tpu.pipeline_mode<synchronous>, transform_indices = @transform_1, window_bounds = array<i64: 32, 16>}, {pipeline_mode = #tpu.pipeline_mode<synchronous>, transform_indices = @transform_2, window_bounds = array<i64: 1, 16>}, {pipeline_mode = #tpu.pipeline_mode<synchronous>, transform_indices = @transform_3, window_bounds = array<i64: 16, 4>}, {pipeline_mode = #tpu.pipeline_mode<synchronous>, transform_indices = @transform_4, window_bounds = array<i64: 1, 4>}, {transform_indices = @transform_5, window_bounds = array<i64: 128, 4>}]} {
    %c0 = arith.constant 0 : index
    %c0_0 = arith.constant 0 : index
    %0 = vector.load %arg1[%c0, %c0_0] : memref<128x32xf32, #tpu.memory_space<vmem>>, vector<128x32xf32>
    %c0_1 = arith.constant 0 : index
    %c0_2 = arith.constant 0 : index
    %1 = vector.load %arg2[%c0_1, %c0_2] : memref<32x16xf32, #tpu.memory_space<vmem>>, vector<32x16xf32>
    %c0_3 = arith.constant 0 : index
    %c0_4 = arith.constant 0 : index
    %2 = vector.load %arg4[%c0_3, %c0_4] : memref<16x4xf32, #tpu.memory_space<vmem>>, vector<16x4xf32>
    %cst = arith.constant dense<0.000000e+00> : vector<128x16xf32>
    %3 = tpu.matmul %0, %1, %cst {dimension_numbers = #tpu.dot_dimension_numbers<[1], [0], [0], [1], [0, 0, 1, 1], [], []>} : vector<128x32xf32>, vector<32x16xf32>, vector<128x16xf32> -> vector<128x16xf32>
    %c0_5 = arith.constant 0 : index
    %c0_6 = arith.constant 0 : index
    %4 = vector.load %arg3[%c0_5, %c0_6] : memref<1x16xf32, #tpu.memory_space<vmem>>, vector<1x16xf32>
    %5 = vector.broadcast %4 : vector<1x16xf32> to vector<128x16xf32>
    %6 = arith.addf %3, %5 : vector<128x16xf32>
    %cst_7 = arith.constant 0.000000e+00 : f32
    %7 = vector.broadcast %cst_7 : f32 to vector<128x16xf32>
    %8 = arith.maximumf %6, %7 : vector<128x16xf32>
    %cst_8 = arith.constant dense<0.000000e+00> : vector<128x4xf32>
    %9 = tpu.matmul %8, %2, %cst_8 {dimension_numbers = #tpu.dot_dimension_numbers<[1], [0], [0], [1], [0, 0, 1, 1], [], []>} : vector<128x16xf32>, vector<16x4xf32>, vector<128x4xf32> -> vector<128x4xf32>
    %c0_9 = arith.constant 0 : index
    %c0_10 = arith.constant 0 : index
    %10 = vector.load %arg5[%c0_9, %c0_10] : memref<1x4xf32, #tpu.memory_space<vmem>>, vector<1x4xf32>
    %11 = vector.broadcast %10 : vector<1x4xf32> to vector<128x4xf32>
    %12 = arith.addf %9, %11 : vector<128x4xf32>
    %13 = arith.negf %12 : vector<128x4xf32>
    %14 = math.exp %13 : vector<128x4xf32>
    %cst_11 = arith.constant 1.000000e+00 : f32
    %15 = vector.broadcast %cst_11 : f32 to vector<128x4xf32>
    %16 = arith.addf %15, %14 : vector<128x4xf32>
    %17 = arith.divf %15, %16 : vector<128x4xf32>
    %c0_12 = arith.constant 0 : index
    %c0_13 = arith.constant 0 : index
    %18 = vector.load %arg6[%c0_12, %c0_13] : memref<128x4xf32, #tpu.memory_space<vmem>>, vector<128x4xf32>
    tpu.vector_store %arg6[%c0_12, %c0_13], %17 {strides = array<i32>} : memref<128x4xf32, #tpu.memory_space<vmem>>, vector<128x4xf32>,
    return
  }
  func.func @transform_0(%arg0: i32) -> (i32, i32) {
    %c0_i32 = arith.constant 0 : i32
    %c0_i32_0 = arith.constant 0 : i32
    return %arg0, %c0_i32 : i32, i32
  }
  func.func @transform_1(%arg0: i32) -> (i32, i32) {
    %c0_i32 = arith.constant 0 : i32
    %c0_i32_0 = arith.constant 0 : i32
    %c0_i32_1 = arith.constant 0 : i32
    return %c0_i32, %c0_i32_0 : i32, i32
  }
  func.func @transform_2(%arg0: i32) -> (i32, i32) {
    %c0_i32 = arith.constant 0 : i32
    %c0_i32_0 = arith.constant 0 : i32
    %c0_i32_1 = arith.constant 0 : i32
    return %c0_i32, %c0_i32_0 : i32, i32
  }
  func.func @transform_3(%arg0: i32) -> (i32, i32) {
    %c0_i32 = arith.constant 0 : i32
    %c0_i32_0 = arith.constant 0 : i32
    %c0_i32_1 = arith.constant 0 : i32
    return %c0_i32, %c0_i32_0 : i32, i32
  }
  func.func @transform_4(%arg0: i32) -> (i32, i32) {
    %c0_i32 = arith.constant 0 : i32
    %c0_i32_0 = arith.constant 0 : i32
    %c0_i32_1 = arith.constant 0 : i32
    return %c0_i32, %c0_i32_0 : i32, i32
  }
  func.func @transform_5(%arg0: i32) -> (i32, i32) {
    %c0_i32 = arith.constant 0 : i32
    %c0_i32_0 = arith.constant 0 : i32
    return %arg0, %c0_i32 : i32, i32
  }
}

</mosaic_0001>

<bundles_post_ra>
// kernel: tpu_custom_call.1
= control target key start
LH: loop header
LB: loop body
LE: loop exit
PB: predicated region body
PF: predicated region fallthrough
CT: control target
= control target key end

     0   :  { %s1118_s18 = smov 0   ;;  %s1268_s0 = inlined_call_operand.vmem [shape: f32[250,32], index: 0, kind: input, shape index: {}]   ;;  %s1269_s1 = inlined_call_operand.vmem [shape: f32[32,16], index: 1, kind: input, shape index: {}]   ;;  %s1270_s2 = inlined_call_operand.vmem [shape: f32[1,16], index: 2, kind: input, shape index: {}]   ;;  %s1271_s3 = inlined_call_operand.vmem [shape: f32[16,4], index: 3, kind: input, shape index: {}]   ;;  %s1272_s4 = inlined_call_operand.vmem [shape: f32[1,4], index: 4, kind: input, shape index: {}]   ;;  %s1273_s5 = inlined_call_operand.vmem [shape: f32[250,4], index: 5, kind: output, shape index: {}]  }
   0x1 LB: > { %s837_s19 = sadd.s32 4294967295, %s1086_s18   ;;  %p841_p0 = scmp.ge.s32.totalorder %s1086_s18, 1  ;;  %s1086_s18 = sphi %s1118_s18, %s15_s18  }
   0x2   : > { %p188_p1 = scmp.lt.s32.totalorder %s1086_s18, 3 }
   0x4   : > { %p189_p2 = pnand %p841_p0, %p188_p1 }
   0x5   : > { %v244_v0 = vld [vmem:[%s1269_s1] sm:$0xff] (!%p189_p2)  ;;  %v245_v1 = vld [vmem:[%s1269_s1 + $0x8] sm:$0xff] (!%p189_p2)  ;;  %v246_v2 = vld [vmem:[%s1269_s1 + $0x10] sm:$0xff] (!%p189_p2)  ;;  %s842_s26 = sshll.u32 (!%p189_p2), %s837_s19, 4  ;;  %vm257_vm0 = vcmask (!%p189_p2), 261120   ;;  %vm474_vm1 = vcmask (!%p189_p2), 130048  }
   0x6   : > { %192 = sbr.rel (%p189_p2) target bundleno = 508 (0x1fc), region = 40  ;;  %v996_v3 = vpack.c.bf16 (!%p189_p2), %v245_v1, %v244_v0  ;;  %v247_v4 = vld [vmem:[%s1269_s1 + $0x18] sm:$0xff] (!%p189_p2)  ;;  %p217_p3 = scmp.lt.s32.totalorder (!%p189_p2), %s842_s26, 31  ;;  %v248_v22 = vld [vmem:[%s1271_s3] sm:$0xff] (!%p189_p2)  ;;  %v249_v23 = vld [vmem:[%s1271_s3 + $0x8] sm:$0xff] (!%p189_p2)  ;;  %vm764_vm2 = vcmask (!%p189_p2), 31744  }
   0x7   : > { %v1000_v5 = vpack.c.bf16 (!%p189_p2), %v247_v4, %v246_v2  ;;  %v1004_v24 = vpack.c.bf16 (!%p189_p2), %v249_v23, %v248_v22  ;;  %v846_v25 = vld [vmem:[%s1270_s2] ss:$0 sm:$0xff] (!%p189_p2) }
   0x8   : > { %997 = vmatprep.subr.bf16.mxu0 (!%p189_p2), %v996_v3 }
   0x9   : > { %999 = vmatpush3.bf16.msra.mxu0 (!%p189_p2), %v996_v3  ;;  %1005 = vmatprep.subr.bf16.mxu1 (!%p189_p2), %v1004_v24 }
   0xa   : > { %1001 = vmatprep.subr.bf16.mxu0 (!%p189_p2), %v1000_v5  ;;  %1007 = vmatpush3.bf16.msra.mxu1 (!%p189_p2), %v1004_v24 }
   0xd   : > { %s1275_s26 = smov (!%p217_p3, %s842_s26), 31  ;;  %1003 = vmatpush3.bf16.msra.mxu0 %v1000_v5 }
   0xe   : > { %s843_s29 = sshll.u32 %s1275_s26, 3 }
   0xf   : > { %s1146_s7 = scalar_lea.vmem %s1268_s0, %s843_s29  ;;  %s1228_s19 = scalar_lea.vmem %s1273_s5, %s843_s29 }
  0x10   : > { %v228_v6 = vld [vmem:[%s1146_s7] sm:$0xff]  ;;  %v229_v7 = vld [vmem:[%s1146_s7 + $0x8] sm:$0xff]  ;;  %v230_v8 = vld [vmem:[%s1146_s7 + $0x10] sm:$0xff] }
  0x11   : > { %944 = vmatprep.mubr.msk.f32.mxu0 %vm257_vm0, %v228_v6  ;;  %v231_v9 = vld [vmem:[%s1146_s7 + $0x18] sm:$0xff]  ;;  %v232_v10 = vld [vmem:[%s1146_s7 + $0x20] sm:$0xff]  ;;  %v233_v11 = vld [vmem:[%s1146_s7 + $0x28] sm:$0xff] }
  0x12   : > { %945 = vmatmul.mubr.msk.f32.vlgmr.msra.gmra.mrb[0].mxu0 %vm257_vm0, %v229_v7  ;;  %v234_v12 = vld [vmem:[%s1146_s7 + $0x30] sm:$0xff]  ;;  %v235_v13 = vld [vmem:[%s1146_s7 + $0x38] sm:$0xff]  ;;  %v236_v14 = vld [vmem:[%s1146_s7 + $0x40] sm:$0xff] }
  0x13   : > { %947 = vmatprep.mubr.msk.f32.mxu0 %vm257_vm0, %v230_v8  ;;  %v237_v15 = vld [vmem:[%s1146_s7 + $0x48] sm:$0xff]  ;;  %v238_v16 = vld [vmem:[%s1146_s7 + $0x50] sm:$0xff]  ;;  %v239_v17 = vld [vmem:[%s1146_s7 + $0x58] sm:$0xff] }
  0x14   : > { %v240_v18 = vld [vmem:[%s1146_s7 + $0x60] sm:$0xff]  ;;  %v241_v19 = vld [vmem:[%s1146_s7 + $0x68] sm:$0xff]  ;;  %v242_v20 = vld [vmem:[%s1146_s7 + $0x70] sm:$0xff] }
  0x15   : > { %v243_v21 = vld [vmem:[%s1146_s7 + $0x78] sm:$0xff] }
  0x16   : > { %948 = vmatmul.mubr.msk.f32.gmra.mrb[2].mxu0 %vm257_vm0, %v231_v9 }
  0x17   : > { %950 = vmatprep.mubr.msk.f32.mxu0 %vm257_vm0, %v232_v10  ;;  %v1208_v10 = vld [vmem:[%s1272_s4] ss:$0 sm:$0xff] }
  0x1a   : > { %951 = vmatmul.mubr.msk.f32.gmra.mrb[4].mxu0 %vm257_vm0, %v233_v11 }
  0x1b   : > { %953 = vmatprep.mubr.msk.f32.mxu0 %vm257_vm0, %v234_v12 }
  0x1e   : > { %954 = vmatmul.mubr.msk.f32.gmra.mrb[6].mxu0 %vm257_vm0, %v235_v13 }
  0x1f   : > { %956 = vmatprep.mubr.msk.f32.mxu0 %vm257_vm0, %v236_v14 }
  0x22   : > { %957 = vmatmul.mubr.msk.f32.gmra.mrb[8].mxu0 %vm257_vm0, %v237_v15 }
  0x23   : > { %959 = vmatprep.mubr.msk.f32.mxu0 %vm257_vm0, %v238_v16 }
  0x26   : > { %960 = vmatmul.mubr.msk.f32.gmra.mrb[10].mxu0 %vm257_vm0, %v239_v17 }
  0x27   : > { %962 = vmatprep.mubr.msk.f32.mxu0 %vm257_vm0, %v240_v18 }
  0x2a   : > { %963 = vmatmul.mubr.msk.f32.gmra.mrb[12].mxu0 %vm257_vm0, %v241_v19 }
  0x2b   : > { %965 = vmatprep.mubr.msk.f32.mxu0 %vm257_vm0, %v242_v20 }
  0x2e   : > { %966 = vmatmul.mubr.msk.f32.gmra.mrb[14].mxu0 %vm257_vm0, %v243_v21 }
  0xe5   : > { %v946_v26 = vpop.f32.mrb[0].mxu0 }
  0xe6   : > { %v378_v27 = vadd.f32 %v946_v26, %v846_v25  ;;  %v372_v28 = vpop.f32.mrb[1].mxu0 }
  0xe7   : > { %v373_v29 = vadd.f32 %v846_v25, %v372_v28 }
  0xe8   : > { %v452_v32 = vmax.f32 %v378_v27, 0.0 }
  0xe9   : > { %v451_v30 = vmax.f32 %v373_v29, 0.0  ;;  %v949_v31 = vpop.f32.mrb[2].mxu0 }
  0xea   : > { %v388_v33 = vadd.f32 %v949_v31, %v846_v25  ;;  %v382_v34 = vpop.f32.mrb[3].mxu0 }
  0xeb   : > { %v383_v35 = vadd.f32 %v846_v25, %v382_v34  ;;  %972 = vmatprep.mubr.msk.f32.mxu1 %vm474_vm1, %v451_v30 }
  0xec   : > { %973 = vmatmul.mubr.msk.f32.vlgmr.msra.gmra.mrb[0].mxu1 %vm474_vm1, %v452_v32  ;;  %v454_v38 = vmax.f32 %v388_v33, 0.0 }
  0xed   : > { %v453_v36 = vmax.f32 %v383_v35, 0.0  ;;  %v952_v37 = vpop.f32.mrb[4].mxu0 }
  0xee   : > { %v398_v39 = vadd.f32 %v952_v37, %v846_v25  ;;  %v392_v40 = vpop.f32.mrb[5].mxu0 }
  0xef   : > { %v393_v41 = vadd.f32 %v846_v25, %v392_v40  ;;  %975 = vmatprep.mubr.msk.f32.mxu1 %vm474_vm1, %v453_v36 }
  0xf0   : > { %976 = vmatmul.mubr.msk.f32.gmra.mrb[2].mxu1 %vm474_vm1, %v454_v38  ;;  %v456_v44 = vmax.f32 %v398_v39, 0.0 }
  0xf1   : > { %v455_v42 = vmax.f32 %v393_v41, 0.0  ;;  %v955_v43 = vpop.f32.mrb[6].mxu0 }
  0xf2   : > { %v408_v45 = vadd.f32 %v955_v43, %v846_v25  ;;  %v402_v46 = vpop.f32.mrb[7].mxu0 }
  0xf3   : > { %v403_v47 = vadd.f32 %v846_v25, %v402_v46  ;;  %978 = vmatprep.mubr.msk.f32.mxu1 %vm474_vm1, %v455_v42 }
  0xf4   : > { %979 = vmatmul.mubr.msk.f32.gmra.mrb[4].mxu1 %vm474_vm1, %v456_v44  ;;  %v458_v50 = vmax.f32 %v408_v45, 0.0 }
  0xf5   : > { %v457_v48 = vmax.f32 %v403_v47, 0.0  ;;  %v958_v49 = vpop.f32.mrb[8].mxu0 }
  0xf6   : > { %v418_v51 = vadd.f32 %v958_v49, %v846_v25  ;;  %v412_v52 = vpop.f32.mrb[9].mxu0 }
  0xf7   : > { %v413_v53 = vadd.f32 %v846_v25, %v412_v52  ;;  %981 = vmatprep.mubr.msk.f32.mxu1 %vm474_vm1, %v457_v48 }
  0xf8   : > { %982 = vmatmul.mubr.msk.f32.gmra.mrb[6].mxu1 %vm474_vm1, %v458_v50  ;;  %v460_v56 = vmax.f32 %v418_v51, 0.0 }
  0xf9   : > { %v459_v54 = vmax.f32 %v413_v53, 0.0  ;;  %v961_v55 = vpop.f32.mrb[10].mxu0 }
  0xfa   : > { %v428_v57 = vadd.f32 %v961_v55, %v846_v25  ;;  %v422_v58 = vpop.f32.mrb[11].mxu0 }
  0xfb   : > { %v423_v59 = vadd.f32 %v846_v25, %v422_v58  ;;  %984 = vmatprep.mubr.msk.f32.mxu1 %vm474_vm1, %v459_v54 }
  0xfc   : > { %985 = vmatmul.mubr.msk.f32.gmra.mrb[8].mxu1 %vm474_vm1, %v460_v56  ;;  %v462_v62 = vmax.f32 %v428_v57, 0.0 }
  0xfd   : > { %v461_v60 = vmax.f32 %v423_v59, 0.0  ;;  %v964_v61 = vpop.f32.mrb[12].mxu0 }
  0xfe   : > { %v438_v63 = vadd.f32 %v964_v61, %v846_v25  ;;  %v432_v0 = vpop.f32.mrb[13].mxu0 }
  0xff   : > { %v433_v1 = vadd.f32 %v846_v25, %v432_v0  ;;  %987 = vmatprep.mubr.msk.f32.mxu1 %vm474_vm1, %v461_v60 }
 0x100   : > { %988 = vmatmul.mubr.msk.f32.gmra.mrb[10].mxu1 %vm474_vm1, %v462_v62  ;;  %v464_v4 = vmax.f32 %v438_v63, 0.0 }
 0x101   : > { %v463_v2 = vmax.f32 %v433_v1, 0.0  ;;  %v967_v3 = vpop.f32.mrb[14].mxu0 }
 0x102   : > { %v448_v5 = vadd.f32 %v967_v3, %v846_v25  ;;  %v442_v6 = vpop.f32.mrb[15].mxu0 }
 0x103   : > { %v443_v7 = vadd.f32 %v846_v25, %v442_v6  ;;  %990 = vmatprep.mubr.msk.f32.mxu1 %vm474_vm1, %v463_v2 }
 0x104   : > { %991 = vmatmul.mubr.msk.f32.gmra.mrb[12].mxu1 %vm474_vm1, %v464_v4  ;;  %v466_v9 = vmax.f32 %v448_v5, 0.0 }
 0x105   : > { %v465_v8 = vmax.f32 %v443_v7, 0.0 }
 0x107   : > { %993 = vmatprep.mubr.msk.f32.mxu1 %vm474_vm1, %v465_v8 }
 0x108   : > { %994 = vmatmul.mubr.msk.f32.gmra.mrb[14].mxu1 %vm474_vm1, %v466_v9 }
 0x1bf   : > { %v974_v11 = vpop.f32.mrb[0].mxu1 }
 0x1c0   : > { %v595_v12 = vadd.f32 %v974_v11, %v1208_v10  ;;  %v589_v13 = vpop.f32.mrb[1].mxu1 }
 0x1c1   : > { %v590_v14 = vadd.f32 %v1208_v10, %v589_v13 }
 0x1c2   : > { %v881_v15 = vmul.f32 -1.442695, %v595_v12 }
 0x1c3   : > { %v880_v16 = vmul.f32 -1.442695, %v590_v14  ;;  %v977_v17 = vpop.f32.mrb[2].mxu1 }
 0x1c4   : > { %1016 = vpow2.f32 %v881_v15  ;;  %v605_v18 = vadd.f32 %v977_v17, %v1208_v10  ;;  %v599_v19 = vpop.f32.mrb[3].mxu1 }
 0x1c5   : > { %1018 = vpow2.f32 %v880_v16  ;;  %v600_v20 = vadd.f32 %v1208_v10, %v599_v19 }
 0x1c6   : > { %v883_v21 = vmul.f32 -1.442695, %v605_v18 }
 0x1c7   : > { %v882_v22 = vmul.f32 -1.442695, %v600_v20  ;;  %v980_v23 = vpop.f32.mrb[4].mxu1 }
 0x1c8   : > { %1020 = vpow2.f32 %v883_v21  ;;  %v615_v24 = vadd.f32 %v980_v23, %v1208_v10  ;;  %v609_v25 = vpop.f32.mrb[5].mxu1 }
 0x1c9   : > { %1022 = vpow2.f32 %v882_v22  ;;  %v610_v26 = vadd.f32 %v1208_v10, %v609_v25 }
 0x1ca   : > { %v885_v27 = vmul.f32 -1.442695, %v615_v24 }
 0x1cb   : > { %v884_v28 = vmul.f32 -1.442695, %v610_v26  ;;  %v983_v29 = vpop.f32.mrb[6].mxu1 }
 0x1cc   : > { %1024 = vpow2.f32 %v885_v27  ;;  %v625_v30 = vadd.f32 %v983_v29, %v1208_v10  ;;  %v619_v31 = vpop.f32.mrb[7].mxu1 }
 0x1cd   : > { %1026 = vpow2.f32 %v884_v28  ;;  %v620_v32 = vadd.f32 %v1208_v10, %v619_v31 }
 0x1ce   : > { %v1017_v33 = vpop.eup %1016  ;;  %v887_v34 = vmul.f32 -1.442695, %v625_v30 }
 0x1cf   : > { %v1019_v35 = vpop.eup %1018  ;;  %v717_v36 = vadd.f32 1.0, %v1017_v33  ;;  %v886_v37 = vmul.f32 -1.442695, %v620_v32  ;;  %v986_v38 = vpop.f32.mrb[8].mxu1 }
 0x1d0   : > { %v716_v39 = vadd.f32 1.0, %v1019_v35  ;;  %1028 = vpow2.f32 %v887_v34  ;;  %v635_v40 = vadd.f32 %v986_v38, %v1208_v10  ;;  %v629_v41 = vpop.f32.mrb[9].mxu1 }
 0x1d1   : > { %1030 = vrcp.f32 %v717_v36  ;;  %v630_v42 = vadd.f32 %v1208_v10, %v629_v41 }
 0x1d2   : > { %v1021_v43 = vpop.eup %1020  ;;  %1032 = vrcp.f32 %v716_v39  ;;  %v889_v44 = vmul.f32 -1.442695, %v635_v40 }
 0x1d3   : > { %v1023_v45 = vpop.eup %1022  ;;  %v719_v46 = vadd.f32 1.0, %v1021_v43  ;;  %1034 = vpow2.f32 %v886_v37  ;;  %v888_v47 = vmul.f32 -1.442695, %v630_v42  ;;  %v989_v48 = vpop.f32.mrb[10].mxu1 }
 0x1d4   : > { %v718_v49 = vadd.f32 1.0, %v1023_v45  ;;  %1036 = vpow2.f32 %v889_v44  ;;  %v645_v50 = vadd.f32 %v989_v48, %v1208_v10  ;;  %v639_v51 = vpop.f32.mrb[11].mxu1 }
 0x1d5   : > { %1038 = vrcp.f32 %v719_v46  ;;  %v640_v52 = vadd.f32 %v1208_v10, %v639_v51 }
 0x1d6   : > { %v1025_v53 = vpop.eup %1024  ;;  %1040 = vrcp.f32 %v718_v49  ;;  %v891_v54 = vmul.f32 -1.442695, %v645_v50 }
 0x1d7   : > { %v1027_v55 = vpop.eup %1026  ;;  %v721_v56 = vadd.f32 1.0, %v1025_v53  ;;  %1042 = vpow2.f32 %v888_v47  ;;  %v890_v57 = vmul.f32 -1.442695, %v640_v52  ;;  %v992_v58 = vpop.f32.mrb[12].mxu1 }
 0x1d8   : > { %v720_v59 = vadd.f32 1.0, %v1027_v55  ;;  %1044 = vpow2.f32 %v891_v54  ;;  %v655_v60 = vadd.f32 %v992_v58, %v1208_v10  ;;  %v649_v61 = vpop.f32.mrb[13].mxu1 }
 0x1d9   : > { %1046 = vrcp.f32 %v721_v56  ;;  %v650_v62 = vadd.f32 %v1208_v10, %v649_v61 }
 0x1da   : > { %v1029_v63 = vpop.eup %1028  ;;  %1048 = vrcp.f32 %v720_v59  ;;  %v893_v0 = vmul.f32 -1.442695, %v655_v60 }
 0x1db   : > { %v1031_v1 = vpop.eup %1030  ;;  %v723_v2 = vadd.f32 1.0, %v1029_v63  ;;  %1050 = vpow2.f32 %v890_v57  ;;  %v892_v3 = vmul.f32 -1.442695, %v650_v62  ;;  %v995_v4 = vpop.f32.mrb[14].mxu1 }
 0x1dc   : > { %v1033_v5 = vpop.eup %1032  ;;  %766 = vst.msk [vmem:[%s1228_s19 + $0x8] sm:$0xff] %vm764_vm2, %v1031_v1  ;;  %1052 = vpow2.f32 %v893_v0  ;;  %v665_v6 = vadd.f32 %v995_v4, %v1208_v10  ;;  %v659_v7 = vpop.f32.mrb[15].mxu1 }
 0x1dd   : > { %v1035_v8 = vpop.eup %1034  ;;  %765 = vst.msk [vmem:[%s1228_s19] sm:$0xff] %vm764_vm2, %v1033_v5  ;;  %1054 = vrcp.f32 %v723_v2  ;;  %v660_v9 = vadd.f32 %v1208_v10, %v659_v7 }
 0x1de   : > { %v1037_v11 = vpop.eup %1036  ;;  %v722_v12 = vadd.f32 1.0, %v1035_v8  ;;  %1056 = vpow2.f32 %v892_v3  ;;  %v895_v13 = vmul.f32 -1.442695, %v665_v6 }
 0x1df   : > { %v1039_v14 = vpop.eup %1038  ;;  %v725_v15 = vadd.f32 1.0, %v1037_v11  ;;  %v894_v16 = vmul.f32 -1.442695, %v660_v9 }
 0x1e0   : > { %v1041_v17 = vpop.eup %1040  ;;  %768 = vst.msk [vmem:[%s1228_s19 + $0x18] sm:$0xff] %vm764_vm2, %v1039_v14  ;;  %1058 = vrcp.f32 %v722_v12 }
 0x1e1   : > { %v1043_v18 = vpop.eup %1042  ;;  %767 = vst.msk [vmem:[%s1228_s19 + $0x10] sm:$0xff] %vm764_vm2, %v1041_v17  ;;  %1060 = vrcp.f32 %v725_v15 }
 0x1e2   : > { %v1045_v19 = vpop.eup %1044  ;;  %v724_v20 = vadd.f32 1.0, %v1043_v18  ;;  %1062 = vpow2.f32 %v895_v13 }
 0x1e3   : > { %v1047_v10 = vpop.eup %1046  ;;  %v727_v21 = vadd.f32 1.0, %v1045_v19  ;;  %1064 = vpow2.f32 %v894_v16 }
 0x1e4   : > { %v1049_v22 = vpop.eup %1048  ;;  %770 = vst.msk [vmem:[%s1228_s19 + $0x28] sm:$0xff] %vm764_vm2, %v1047_v10  ;;  %1066 = vrcp.f32 %v724_v20 }
 0x1e5   : > { %v1051_v23 = vpop.eup %1050  ;;  %769 = vst.msk [vmem:[%s1228_s19 + $0x20] sm:$0xff] %vm764_vm2, %v1049_v22  ;;  %1068 = vrcp.f32 %v727_v21 }
 0x1e6   : > { %v1053_v24 = vpop.eup %1052  ;;  %v726_v25 = vadd.f32 1.0, %v1051_v23 }
 0x1e7   : > { %v1055_v26 = vpop.eup %1054  ;;  %v729_v27 = vadd.f32 1.0, %v1053_v24 }
 0x1e8   : > { %v1057_v28 = vpop.eup %1056  ;;  %772 = vst.msk [vmem:[%s1228_s19 + $0x38] sm:$0xff] %vm764_vm2, %v1055_v26  ;;  %1070 = vrcp.f32 %v726_v25 }
 0x1e9   : > { %1072 = vrcp.f32 %v729_v27  ;;  %v728_v29 = vadd.f32 1.0, %v1057_v28 }
 0x1ea   : > { %v1059_v30 = vpop.eup %1058 }
 0x1eb   : > { %v1061_v31 = vpop.eup %1060  ;;  %771 = vst.msk [vmem:[%s1228_s19 + $0x30] sm:$0xff] %vm764_vm2, %v1059_v30  ;;  %1074 = vrcp.f32 %v728_v29 }
 0x1ec   : > { %v1063_v32 = vpop.eup %1062  ;;  %774 = vst.msk [vmem:[%s1228_s19 + $0x48] sm:$0xff] %vm764_vm2, %v1061_v31 }
 0x1ed   : > { %v1065_v33 = vpop.eup %1064  ;;  %v731_v34 = vadd.f32 1.0, %v1063_v32 }
 0x1ee   : > { %v1067_v35 = vpop.eup %1066  ;;  %v730_v36 = vadd.f32 1.0, %v1065_v33 }
 0x1ef   : > { %v1069_v37 = vpop.eup %1068  ;;  %773 = vst.msk [vmem:[%s1228_s19 + $0x40] sm:$0xff] %vm764_vm2, %v1067_v35  ;;  %1076 = vrcp.f32 %v731_v34 }
 0x1f0   : > { %776 = vst.msk [vmem:[%s1228_s19 + $0x58] sm:$0xff] %vm764_vm2, %v1069_v37  ;;  %1078 = vrcp.f32 %v730_v36 }
 0x1f2   : > { %v1071_v38 = vpop.eup %1070 }
 0x1f3   : > { %v1073_v39 = vpop.eup %1072  ;;  %775 = vst.msk [vmem:[%s1228_s19 + $0x50] sm:$0xff] %vm764_vm2, %v1071_v38 }
 0x1f4   : > { %778 = vst.msk [vmem:[%s1228_s19 + $0x68] sm:$0xff] %vm764_vm2, %v1073_v39 }
 0x1f5   : > { %v1075_v40 = vpop.eup %1074 }
 0x1f6   : > { %777 = vst.msk [vmem:[%s1228_s19 + $0x60] sm:$0xff] %vm764_vm2, %v1075_v40 }
 0x1f9   : > { %v1077_v41 = vpop.eup %1076 }
 0x1fa   : > { %v1079_v42 = vpop.eup %1078  ;;  %780 = vst.msk [vmem:[%s1228_s19 + $0x78] sm:$0xff] %vm764_vm2, %v1077_v41 }
 0x1fb   : > { %779 = vst.msk [vmem:[%s1228_s19 + $0x70] sm:$0xff] %vm764_vm2, %v1079_v42 }
 0x1fc PF: > { %s15_s18 = sadd.s32 1, %s1086_s18  }
 0x1fd   : > { %p12_p4 = scmp.ge.s32.totalorder %s15_s18, 4  }
 0x1ff   :  { %14 = sbr.rel (!%p12_p4) target bundleno = 1 (0x1), region = 70 }

</bundles_post_ra>
